<compile_context>
chip_gen: v7x
topology: tpu7x:2x2x1
jax: 0.10.0
libtpu: 0.0.40
codegen_flags: <defaults>
</compile_context>

<pallas_src>
import jax
import jax.numpy as jnp
from jax.experimental import pallas as pl
from jax.experimental.pallas import tpu as pltpu


# --------------------------------------------------------------------------
# Kernel
# --------------------------------------------------------------------------
def dynamics_kernel(x_ref, w1_ref, b1_ref, w2_ref, b2_ref, w3_ref, b3_ref,
                    o_ref):
    # Layer 1 (normalization folded into w1/b1) + ReLU
    h = jnp.dot(x_ref[...], w1_ref[...], preferred_element_type=jnp.float32)
    h = jnp.maximum(h + b1_ref[...], 0.0)
    # Layer 2 + ReLU
    h = jnp.dot(h, w2_ref[...], preferred_element_type=jnp.float32)
    h = jnp.maximum(h + b2_ref[...], 0.0)
    # Output layer (diff_scale / diff_mean folded into w3/b3), unpadded
    out = jnp.dot(h, w3_ref[...], preferred_element_type=jnp.float32) + b3_ref[...]
    o_ref[...] = out.astype(o_ref.dtype)


# --------------------------------------------------------------------------
# Tiling policy
# --------------------------------------------------------------------------
def _pick_tb(B, tb_max=2048, target_steps=8):
    """Batch tile: aim for ~target_steps grid steps (>=2) so DMA overlaps
    compute and v7x can shard the batch axis across both TensorCores.
    256-aligned (satisfies the 8-sublane rule and keeps the MXU M-dim full);
    for tiny batches use the full extent (exempt from divisibility rules)."""
    if B <= 256:
        return B
    tb = -(-B // target_steps)              # cdiv
    tb = ((tb + 255) // 256) * 256          # 256-aligned
    tb = max(256, min(tb, tb_max))
    return min(tb, B)


# --------------------------------------------------------------------------
# Wrapper
# --------------------------------------------------------------------------
def dynamics_forward(s, a, params, *, tb_max=2048):
    """Fused forward. `params` produced by prepare_params()."""
    B = s.shape[0]
    w1, b1 = params["w1"], params["b1"]
    w2, b2 = params["w2"], params["b2"]
    w3, b3 = params["w3"], params["b3"]
    in_dim = w1.shape[0]
    h1, h2 = w1.shape[1], w2.shape[1]
    out_dim = w3.shape[1]

    # Pre-pack raw (s, a) -> (B, state+act). Normalization is folded into
    # w1/b1, so this is the only pre-kernel glue; it lets layer 1 be a single
    # MXU dot instead of two (the split dots doubled MXU pushes at K,N << 128).
    x = jnp.concatenate([s, a], axis=-1).astype(jnp.float32)

    tb = _pick_tb(B, tb_max)
    grid = (pl.cdiv(B, tb),)

    def const_spec(shape):
        # Constant block index -> weights/biases stay resident in VMEM across
        # all grid steps (single DMA).
        return pl.BlockSpec(shape, lambda i: (0, 0))

    flops = 2 * B * (in_dim * h1 + h1 * h2 + h2 * out_dim)
    bytes_accessed = 4 * (
        B * (in_dim + out_dim)
        + w1.size + b1.size + w2.size + b2.size + w3.size + b3.size
    )

    out = pl.pallas_call(
        dynamics_kernel,
        out_shape=jax.ShapeDtypeStruct((B, out_dim), jnp.float32),
        grid=grid,
        in_specs=[
            pl.BlockSpec((tb, in_dim), lambda i: (i, 0)),   # packed (s, a)
            const_spec(w1.shape),                           # W1' (norm folded)
            const_spec(b1.shape),                           # b1'
            const_spec(w2.shape),                           # W2
            const_spec(b2.shape),                           # b2
            const_spec(w3.shape),                           # W3' (diff folded)
            const_spec(b3.shape),                           # b3'
        ],
        out_specs=pl.BlockSpec((tb, out_dim), lambda i: (i, 0)),
        compiler_params=pltpu.CompilerParams(
            dimension_semantics=("parallel",)),   # v7x: batch over both TCs
        cost_estimate=pl.CostEstimate(
            flops=flops, transcendentals=0, bytes_accessed=bytes_accessed),
    )(x, w1, b1, w2, b2, w3, b3)
    return out


# --------------------------------------------------------------------------
# Parameter setup (constant folding, done once)
# --------------------------------------------------------------------------
def prepare_params(raw, state_dim, act_dim):
    """Fold input normalization into W1/b1 and output denormalization into
    W3/b3. Weights stored as (in, out); biases as (1, out)."""
    w1, b1 = raw["w1"], raw["b1"]                     # (state+act, h1), (h1,)
    w2, b2 = raw["w2"], raw["b2"]
    w3, b3 = raw["w3"], raw["b3"]                     # (h2, out_dim), (out_dim,)

    inv = jnp.concatenate([1.0 / raw["state_scale"],   # module uses no epsilon
                           1.0 / raw["action_scale"]])
    mean = jnp.concatenate([raw["state_mean"], raw["action_mean"]])

    # ((x - mean) * inv) @ W1 + b1  ==  x @ (inv[:,None] * W1) + (b1 - (mean*inv) @ W1)
    w1_f = w1 * inv[:, None]
    b1_f = b1 - (mean * inv) @ w1

    # (h @ W3 + b3) * diff_scale + diff_mean  ==  h @ W3' + b3'
    w3_f = w3 * raw["diff_scale"][None, :]
    b3_f = b3 * raw["diff_scale"] + raw["diff_mean"]

    return {
        "w1": w1_f.astype(jnp.float32),
        "b1": b1_f.reshape(1, -1).astype(jnp.float32),
        "w2": w2.astype(jnp.float32),
        "b2": b2.reshape(1, -1).astype(jnp.float32),
        "w3": w3_f.astype(jnp.float32),
        "b3": b3_f.reshape(1, -1).astype(jnp.float32),
    }


def init_raw_params(key, state_dim, act_dim, hidden_sizes):
    """nn.Linear-style init + non-trivial dataset transformation stats."""
    layer_sizes = (state_dim + act_dim,) + tuple(hidden_sizes) + (state_dim,)
    n_layers = len(layer_sizes) - 1
    keys = jax.random.split(key, 2 * n_layers + 6)
    raw = {}
    for i in range(n_layers):
        fan_in, fan_out = layer_sizes[i], layer_sizes[i + 1]
        bound = 1.0 / (fan_in ** 0.5)
        raw[f"w{i+1}"] = jax.random.uniform(
            keys[2 * i], (fan_in, fan_out), jnp.float32, -bound, bound)
        raw[f"b{i+1}"] = jax.random.uniform(
            keys[2 * i + 1], (fan_out,), jnp.float32, -bound, bound)
    k = 2 * n_layers
    raw["state_mean"] = jax.random.normal(keys[k + 0], (state_dim,), jnp.float32)
    raw["state_scale"] = 0.5 + jax.random.uniform(keys[k + 1], (state_dim,), jnp.float32)
    raw["action_mean"] = jax.random.normal(keys[k + 2], (act_dim,), jnp.float32)
    raw["action_scale"] = 0.5 + jax.random.uniform(keys[k + 3], (act_dim,), jnp.float32)
    raw["diff_mean"] = jax.random.normal(keys[k + 4], (state_dim,), jnp.float32)
    raw["diff_scale"] = 0.5 + jax.random.uniform(keys[k + 5], (state_dim,), jnp.float32)
    return raw


# --------------------------------------------------------------------------
# Pure-JAX reference of the original module's forward (unfolded)
# --------------------------------------------------------------------------
def reference_forward(s, a, raw):
    s_n = (s - raw["state_mean"]) / raw["state_scale"]
    a_n = (a - raw["action_mean"]) / raw["action_scale"]
    x = jnp.concatenate([s_n, a_n], axis=-1)
    h = jnp.maximum(x @ raw["w1"] + raw["b1"], 0.0)
    h = jnp.maximum(h @ raw["w2"] + raw["b2"], 0.0)
    out = h @ raw["w3"] + raw["b3"]
    return out * raw["diff_scale"] + raw["diff_mean"]


if __name__ == "__main__":
    state_dim, act_dim = 16, 8
    hidden_sizes = (64, 32)          # module default
    key = jax.random.PRNGKey(0)
    kp, ks, ka = jax.random.split(key, 3)
    raw = init_raw_params(kp, state_dim, act_dim, hidden_sizes)
    params = prepare_params(raw, state_dim, act_dim)

    fwd = jax.jit(lambda s_, a_: dynamics_forward(s_, a_, params))

    # Case 1: tiny batch -> full-extent block, grid = 1.
    s1 = jax.random.normal(ks, (8, state_dim), jnp.float32)
    a1 = jax.random.normal(ka, (8, act_dim), jnp.float32)
    out1 = jax.block_until_ready(fwd(s1, a1))
    ref1 = reference_forward(s1, a1, raw)
    assert out1.shape == (8, state_dim)
    assert jnp.allclose(out1, ref1, atol=1e-4, rtol=1e-4), (
        float(jnp.max(jnp.abs(out1 - ref1))))

    # Case 2: larger batch -> 256-row tiles, multi-step (pipelined) grid.
    ks2, ka2 = jax.random.split(jax.random.PRNGKey(1))
    s2 = jax.random.normal(ks2, (512, state_dim), jnp.float32)
    a2 = jax.random.normal(ka2, (512, act_dim), jnp.float32)
    out2 = jax.block_until_ready(fwd(s2, a2))
    ref2 = reference_forward(s2, a2, raw)
    assert out2.shape == (512, state_dim)
    assert jnp.allclose(out2, ref2, atol=1e-4, rtol=1e-4), (
        float(jnp.max(jnp.abs(out2 - ref2))))

    print("KERNEL_OK")
</pallas_src>

<mosaic_0001>
module attributes {stable_mosaic.version = 11 : i64} {
  func.func @dynamics_kernel(%arg0: i32, %arg1: memref<8x24xf32, #tpu.memory_space<vmem>>, %arg2: memref<24x64xf32, #tpu.memory_space<vmem>>, %arg3: memref<1x64xf32, #tpu.memory_space<vmem>>, %arg4: memref<64x32xf32, #tpu.memory_space<vmem>>, %arg5: memref<1x32xf32, #tpu.memory_space<vmem>>, %arg6: memref<32x16xf32, #tpu.memory_space<vmem>>, %arg7: memref<1x16xf32, #tpu.memory_space<vmem>>, %arg8: memref<8x16xf32, #tpu.memory_space<vmem>>) attributes {dimension_semantics = [#tpu.dimension_semantics<parallel>], iteration_bounds = array<i64: 1>, scalar_prefetch = 0 : i64, scratch_operands = 0 : i64, tpu.core_type = #tpu.core_type<tc>, window_params = [{transform_indices = @transform_0, window_bounds = array<i64: 8, 24>}, {pipeline_mode = #tpu.pipeline_mode<synchronous>, transform_indices = @transform_1, window_bounds = array<i64: 24, 64>}, {pipeline_mode = #tpu.pipeline_mode<synchronous>, transform_indices = @transform_2, window_bounds = array<i64: 1, 64>}, {pipeline_mode = #tpu.pipeline_mode<synchronous>, transform_indices = @transform_3, window_bounds = array<i64: 64, 32>}, {pipeline_mode = #tpu.pipeline_mode<synchronous>, transform_indices = @transform_4, window_bounds = array<i64: 1, 32>}, {pipeline_mode = #tpu.pipeline_mode<synchronous>, transform_indices = @transform_5, window_bounds = array<i64: 32, 16>}, {pipeline_mode = #tpu.pipeline_mode<synchronous>, transform_indices = @transform_6, window_bounds = array<i64: 1, 16>}, {transform_indices = @transform_7, window_bounds = array<i64: 8, 16>}]} {
    %c0 = arith.constant 0 : index
    %c0_0 = arith.constant 0 : index
    %0 = vector.load %arg1[%c0, %c0_0] : memref<8x24xf32, #tpu.memory_space<vmem>>, vector<8x24xf32>
    %c0_1 = arith.constant 0 : index
    %c0_2 = arith.constant 0 : index
    %1 = vector.load %arg2[%c0_1, %c0_2] : memref<24x64xf32, #tpu.memory_space<vmem>>, vector<24x64xf32>
    %cst = arith.constant dense<0.000000e+00> : vector<8x64xf32>
    %2 = tpu.matmul %0, %1, %cst {dimension_numbers = #tpu.dot_dimension_numbers<[1], [0], [0], [1], [0, 0, 1, 1], [], []>} : vector<8x24xf32>, vector<24x64xf32>, vector<8x64xf32> -> vector<8x64xf32>
    %c0_3 = arith.constant 0 : index
    %c0_4 = arith.constant 0 : index
    %3 = vector.load %arg3[%c0_3, %c0_4] : memref<1x64xf32, #tpu.memory_space<vmem>>, vector<1x64xf32>
    %4 = vector.broadcast %3 : vector<1x64xf32> to vector<8x64xf32>
    %5 = arith.addf %2, %4 : vector<8x64xf32>
    %cst_5 = arith.constant 0.000000e+00 : f32
    %6 = vector.broadcast %cst_5 : f32 to vector<8x64xf32>
    %7 = arith.maximumf %5, %6 : vector<8x64xf32>
    %c0_6 = arith.constant 0 : index
    %c0_7 = arith.constant 0 : index
    %8 = vector.load %arg4[%c0_6, %c0_7] : memref<64x32xf32, #tpu.memory_space<vmem>>, vector<64x32xf32>
    %cst_8 = arith.constant dense<0.000000e+00> : vector<8x32xf32>
    %9 = tpu.matmul %7, %8, %cst_8 {dimension_numbers = #tpu.dot_dimension_numbers<[1], [0], [0], [1], [0, 0, 1, 1], [], []>} : vector<8x64xf32>, vector<64x32xf32>, vector<8x32xf32> -> vector<8x32xf32>
    %c0_9 = arith.constant 0 : index
    %c0_10 = arith.constant 0 : index
    %10 = vector.load %arg5[%c0_9, %c0_10] : memref<1x32xf32, #tpu.memory_space<vmem>>, vector<1x32xf32>
    %11 = vector.broadcast %10 : vector<1x32xf32> to vector<8x32xf32>
    %12 = arith.addf %9, %11 : vector<8x32xf32>
    %cst_11 = arith.constant 0.000000e+00 : f32
    %13 = vector.broadcast %cst_11 : f32 to vector<8x32xf32>
    %14 = arith.maximumf %12, %13 : vector<8x32xf32>
    %c0_12 = arith.constant 0 : index
    %c0_13 = arith.constant 0 : index
    %15 = vector.load %arg6[%c0_12, %c0_13] : memref<32x16xf32, #tpu.memory_space<vmem>>, vector<32x16xf32>
    %cst_14 = arith.constant dense<0.000000e+00> : vector<8x16xf32>
    %16 = tpu.matmul %14, %15, %cst_14 {dimension_numbers = #tpu.dot_dimension_numbers<[1], [0], [0], [1], [0, 0, 1, 1], [], []>} : vector<8x32xf32>, vector<32x16xf32>, vector<8x16xf32> -> vector<8x16xf32>
    %c0_15 = arith.constant 0 : index
    %c0_16 = arith.constant 0 : index
    %17 = vector.load %arg7[%c0_15, %c0_16] : memref<1x16xf32, #tpu.memory_space<vmem>>, vector<1x16xf32>
    %18 = vector.broadcast %17 : vector<1x16xf32> to vector<8x16xf32>
    %19 = arith.addf %16, %18 : vector<8x16xf32>
    %c0_17 = arith.constant 0 : index
    %c0_18 = arith.constant 0 : index
    %20 = vector.load %arg8[%c0_17, %c0_18] : memref<8x16xf32, #tpu.memory_space<vmem>>, vector<8x16xf32>
    tpu.vector_store %arg8[%c0_17, %c0_18], %19 {strides = array<i32>} : memref<8x16xf32, #tpu.memory_space<vmem>>, vector<8x16xf32>,
    return
  }
  func.func @transform_0(%arg0: i32) -> (i32, i32) {
    %c0_i32 = arith.constant 0 : i32
    %c0_i32_0 = arith.constant 0 : i32
    return %arg0, %c0_i32 : i32, i32
  }
  func.func @transform_1(%arg0: i32) -> (i32, i32) {
    %c0_i32 = arith.constant 0 : i32
    %c0_i32_0 = arith.constant 0 : i32
    %c0_i32_1 = arith.constant 0 : i32
    return %c0_i32, %c0_i32_0 : i32, i32
  }
  func.func @transform_2(%arg0: i32) -> (i32, i32) {
    %c0_i32 = arith.constant 0 : i32
    %c0_i32_0 = arith.constant 0 : i32
    %c0_i32_1 = arith.constant 0 : i32
    return %c0_i32, %c0_i32_0 : i32, i32
  }
  func.func @transform_3(%arg0: i32) -> (i32, i32) {
    %c0_i32 = arith.constant 0 : i32
    %c0_i32_0 = arith.constant 0 : i32
    %c0_i32_1 = arith.constant 0 : i32
    return %c0_i32, %c0_i32_0 : i32, i32
  }
  func.func @transform_4(%arg0: i32) -> (i32, i32) {
    %c0_i32 = arith.constant 0 : i32
    %c0_i32_0 = arith.constant 0 : i32
    %c0_i32_1 = arith.constant 0 : i32
    return %c0_i32, %c0_i32_0 : i32, i32
  }
  func.func @transform_5(%arg0: i32) -> (i32, i32) {
    %c0_i32 = arith.constant 0 : i32
    %c0_i32_0 = arith.constant 0 : i32
    %c0_i32_1 = arith.constant 0 : i32
    return %c0_i32, %c0_i32_0 : i32, i32
  }
  func.func @transform_6(%arg0: i32) -> (i32, i32) {
    %c0_i32 = arith.constant 0 : i32
    %c0_i32_0 = arith.constant 0 : i32
    %c0_i32_1 = arith.constant 0 : i32
    return %c0_i32, %c0_i32_0 : i32, i32
  }
  func.func @transform_7(%arg0: i32) -> (i32, i32) {
    %c0_i32 = arith.constant 0 : i32
    %c0_i32_0 = arith.constant 0 : i32
    return %arg0, %c0_i32 : i32, i32
  }
}

</mosaic_0001>

<bundles_post_ra>
// kernel: _lambda_.1
= control target key start
LH: loop header
LB: loop body
LE: loop exit
PB: predicated region body
PF: predicated region fallthrough
CT: control target
= control target key end

     0   :  { %12 = vsyncpa [#allocation3], 0  ;;  %s609_s0 = inlined_call_operand.vmem [shape: f32[8,24], index: 0, kind: input, shape index: {}]   ;;  %s610_s1 = inlined_call_operand.hbm [shape: f32[24,64], index: 1, kind: input, shape index: {}]   ;;  %s611_s2 = inlined_call_operand.vmem [shape: f32[1,64], index: 2, kind: input, shape index: {}]   ;;  %s612_s3 = inlined_call_operand.hbm [shape: f32[64,32], index: 3, kind: input, shape index: {}]   ;;  %s613_s4 = inlined_call_operand.vmem [shape: f32[1,32], index: 4, kind: input, shape index: {}]   ;;  %s614_s5 = inlined_call_operand.vmem [shape: f32[32,16], index: 5, kind: input, shape index: {}]   ;;  %s615_s6 = inlined_call_operand.vmem [shape: f32[1,16], index: 6, kind: input, shape index: {}]   ;;  %s616_s7 = inlined_call_operand.hbm [shape: f32[8,16], index: 7, kind: output, shape index: {}]  }
   0x1   :  { %13 = vsyncpa [#allocation6], 0 }
   0x2   :  { %14 = vsyncpa [#allocation4], 0  ;;  %s498_s24 = smov [#allocation2]   ;;  %s426_s28 = scalar_lea.hbm %s610_s1, 384 }
   0x3   :  { %s22_s25 = sshll.u32 %s498_s24, 4  ;;  %p427_p0 = scmp.ne.s32.totalorder %s610_s1, %s426_s28  ;;  %s23_s25 = int_to_ptr.vmem [resolvable:$true] %s22_s25 }
   0x4   :  { %p430_p1 = scmp.lt.u32.totalorder %s426_s28, %s610_s1 }
   0x6   :  { %p432_p2 = pnand %p430_p1, %p427_p0 }
   0x8   :  { %435 = shalt.err (!%p432_p2)
}
   0x9   :  { %s436_s10 = scalar_lea.vmem %s23_s25, 384  ;;  %p441_p4 = scmp.lt.s32.totalorder %s23_s25, %s23_s25 }
   0xa   :  { %p437_p3 = scmp.ne.s32.totalorder %s23_s25, %s436_s10  ;;  %p442_p5 = scmp.lt.s32.totalorder %s436_s10, %s436_s10 }
   0xc   :  { %p443_p6 = por %p442_p5, %p441_p4 }
   0xe   :  { %p444_p7 = pnand %p443_p6, %p437_p3 }
  0x10   :  { %447 = shalt.err (!%p444_p7)
}
  0x11   :  { %s499_s11 = smov 128   ;;  %s500_s12 = smov 8  }
  0x12   :  { %28 = dma.hbm_to_vmem [thread:$0]  %s610_s1, 384, %s23_s25, [#allocation3], %s499_s11, %s499_s11, %s500_s12  }
  0x13   :  { %s501_s15 = smov [#allocation5]   ;;  %s448_s19 = scalar_lea.hbm %s612_s3, 1024 }
  0x14   :  { %s36_s16 = sshll.u32 %s501_s15, 4  ;;  %p449_p8 = scmp.ne.s32.totalorder %s612_s3, %s448_s19  ;;  %s37_s16 = int_to_ptr.vmem [resolvable:$true] %s36_s16 }
  0x15   :  { %p452_p9 = scmp.lt.u32.totalorder %s448_s19, %s612_s3 }
  0x17   :  { %p454_p10 = pnand %p452_p9, %p449_p8 }
  0x19   :  { %457 = shalt.err (!%p454_p10)
}
  0x1a   :  { %s458_s24 = scalar_lea.vmem %s37_s16, 1024  ;;  %p463_p12 = scmp.lt.s32.totalorder %s37_s16, %s37_s16 }
  0x1b   :  { %p459_p11 = scmp.ne.s32.totalorder %s37_s16, %s458_s24  ;;  %p464_p13 = scmp.lt.s32.totalorder %s458_s24, %s458_s24 }
  0x1d   :  { %p465_p0 = por %p464_p13, %p463_p12 }
  0x1f   :  { %p466_p1 = pnand %p465_p0, %p459_p11 }
  0x21   :  { %469 = shalt.err (!%p466_p1)
}
  0x22   :  { %42 = dma.hbm_to_vmem [thread:$0]  %s612_s3, 1024, %s37_s16, [#allocation6], %s499_s11, %s499_s11, %s500_s12  }
  0x23   :  { %492 = dma.done.wait [#allocation3], 384  }
  0x24   :  { %493 = vsyncadd [#allocation3], 4294966912 }
  0x25   :  { %494 = dma.done.wait [#allocation6], 1024  }
  0x26   :  { %495 = vsyncadd [#allocation6], 4294966272  ;;  %v502_v0 = vmov 0.0|0.0   ;;  %vm503_vm0 = vmmov 0   ;;  %v504_v1 = vmov 0.0   ;;  %v56_v2 = vld [vmem:[#allocation2] sm:$0xff] }
  0x27   :  { %397 = vmatprep.subr.bf16.mxu0 %v502_v0  ;;  %364 = vmatprep.mubr.msk.f32.mxu0 %vm503_vm0, %v504_v1  ;;  %v57_v3 = vld [vmem:[#allocation2 + $0x8] sm:$0xff]  ;;  %v141_v5 = vld [vmem:[#allocation5] sm:$0xff]  ;;  %v142_v6 = vld [vmem:[#allocation5 + $0x8] sm:$0xff]  ;;  %vm66_vm1 = vcmask 195584   ;;  %vm156_vm2 = vcmask 523264   ;;  %vm242_vm3 = vcmask 261120  }
  0x28   :  { %400 = vmatprep.subr.bf16.mxu1 %v502_v0  ;;  %383 = vmatprep.mubr.msk.f32.mxu1 %vm503_vm0, %v504_v1  ;;  %v398_v4 = vpack.c.bf16 %v57_v3, %v56_v2  ;;  %v401_v7 = vpack.c.bf16 %v142_v6, %v141_v5  ;;  %v143_v8 = vld [vmem:[#allocation5 + $0x10] sm:$0xff]  ;;  %v144_v9 = vld [vmem:[#allocation5 + $0x18] sm:$0xff]  ;;  %v55_v12 = vld [vmem:[%s609_s0] sm:$0xff]  ;;  %s505_s16 = smov [#allocation7]   ;;  %vm316_vm4 = vcmask 130048  }
  0x29   :  { %v58_v10 = vld [vmem:[#allocation2 + $0x10] sm:$0xff]  ;;  %v404_v11 = vpack.c.bf16 %v144_v9, %v143_v8  ;;  %v145_v13 = vld [vmem:[#allocation5 + $0x20] sm:$0xff]  ;;  %v146_v14 = vld [vmem:[#allocation5 + $0x28] sm:$0xff]  ;;  %s324_s17 = sshll.u32 %s505_s16, 4  ;;  %s325_s17 = int_to_ptr.vmem [resolvable:$true] %s324_s17 }
  0x2a   :  { %399 = vmatpush3.bf16.msra.mxu0 %v398_v4  ;;  %402 = vmatpush3.bf16.msra.mxu1 %v401_v7  ;;  %v407_v15 = vpack.c.bf16 %v146_v14, %v145_v13  ;;  %v147_v16 = vld [vmem:[#allocation5 + $0x30] sm:$0xff]  ;;  %v148_v17 = vld [vmem:[#allocation5 + $0x38] sm:$0xff]  ;;  %v231_v19 = vld [vmem:[%s614_s5] sm:$0xff]  ;;  %p475_p3 = scmp.lt.s32.totalorder %s325_s17, %s325_s17 }
  0x2b   :  { %362 = vmatprep.subr.mxu0 %v504_v1  ;;  %403 = vmatprep.subr.bf16.mxu1 %v502_v0  ;;  %v410_v18 = vpack.c.bf16 %v148_v17, %v147_v16  ;;  %v232_v20 = vld [vmem:[%s614_s5 + $0x8] sm:$0xff]  ;;  %v334_v22 = vld [vmem:[%s611_s2] ss:$0 sm:$0xff]  ;;  %v233_v27 = vld [vmem:[%s614_s5 + $0x10] sm:$0xff] }
  0x2c   :  { %v413_v21 = vpack.c.bf16 %v232_v20, %v231_v19  ;;  %v234_v28 = vld [vmem:[%s614_s5 + $0x18] sm:$0xff]  ;;  %v336_v30 = vld [vmem:[%s613_s4] ss:$0 sm:$0xff]  ;;  %s470_s5 = scalar_lea.vmem %s325_s17, 128 }
  0x2d   :  { %v416_v29 = vpack.c.bf16 %v234_v28, %v233_v27  ;;  %v338_v35 = vld [vmem:[%s615_s6] ss:$0 sm:$0xff]  ;;  %p471_p2 = scmp.ne.s32.totalorder %s325_s17, %s470_s5  ;;  %p476_p4 = scmp.lt.s32.totalorder %s470_s5, %s470_s5 }
  0x2e   :  { %363 = vmatpush3.msra.mxu0 %v58_v10  ;;  %405 = vmatpush3.bf16.msra.mxu1 %v404_v11 }
  0x2f   :  { %365 = vmatmul.mubr.msk.f32.vlgmr.msra.gmra.mrb[0].mxu0 %vm66_vm1, %v55_v12  ;;  %406 = vmatprep.subr.bf16.mxu1 %v502_v0  ;;  %p477_p5 = por %p476_p4, %p475_p3 }
  0x30   :  { %412 = vmatprep.subr.bf16.mxu0 %v502_v0  ;;  %394 = vmatprep.mubr.msk.f32.mxu0 %vm503_vm0, %v504_v1 }
  0x31   :  { %414 = vmatpush3.bf16.msra.mxu0 %v413_v21  ;;  %p478_p6 = pnand %p477_p5, %p471_p2 }
  0x32   :  { %408 = vmatpush3.bf16.msra.mxu1 %v407_v15  ;;  %415 = vmatprep.subr.bf16.mxu0 %v502_v0 }
  0x33   :  { %409 = vmatprep.subr.bf16.mxu1 %v502_v0 }
  0x35   :  { %417 = vmatpush3.bf16.msra.mxu0 %v416_v29 }
  0x36   :  { %411 = vmatpush3.bf16.msra.mxu1 %v410_v18 }
 0x102   :  { %v136_v23 = vpop.f32.mrb[0].mxu0 }
 0x103   :  { %v137_v24 = vadd.f32 %v334_v22, %v136_v23  ;;  %v366_v25 = vpop.f32.mrb[1].mxu0 }
 0x105   :  { %v140_v26 = vmax.f32 %v137_v24, 0.0 }
 0x107   :  { %384 = vmatmul.mubr.msk.f32.vlgmr.msra.gmra.mrb[0].mxu1 %vm156_vm2, %v140_v26 }
 0x1da   :  { %v226_v31 = vpop.f32.mrb[0].mxu1 }
 0x1db   :  { %v227_v32 = vadd.f32 %v336_v30, %v226_v31  ;;  %v385_v33 = vpop.f32.mrb[1].mxu1 }
 0x1dd   :  { %v230_v34 = vmax.f32 %v227_v32, 0.0 }
 0x1df   :  { %395 = vmatmul.mubr.msk.f32.vlgmr.msra.gmra.mrb[2].mxu0 %vm242_vm3, %v230_v34 }
 0x2b2   :  { %v312_v36 = vpop.f32.mrb[2].mxu0 }
 0x2b3   :  { %v313_v37 = vadd.f32 %v338_v35, %v312_v36  ;;  %v396_v38 = vpop.f32.mrb[3].mxu0 }
 0x2b5   :  { %317 = vst.msk [vmem:[#allocation7] sm:$0xff] %vm316_vm4, %v313_v37 }
 0x2b6   :  { %481 = shalt.err (!%p478_p6)
}
 0x2b7   :  { %s482_s19 = scalar_lea.hbm %s616_s7, 128 }
 0x2b8   :  { %p483_p7 = scmp.ne.s32.totalorder %s616_s7, %s482_s19  ;;  %p486_p8 = scmp.lt.u32.totalorder %s482_s19, %s616_s7 }
 0x2ba   :  { %p488_p9 = pnand %p486_p8, %p483_p7 }
 0x2bc   :  { %491 = shalt.err (!%p488_p9)
}
 0x2bd   :  { %327 = dma.vmem_to_hbm [thread:$0]  %s325_s17, 128, %s616_s7, [#allocation4]  }
 0x2be   :  { %496 = dma.done.wait [#allocation4], 128  }
 0x2bf   :  { %497 = vsyncadd [#allocation4], 4294967168 }
 0x2c0   :  { %331 = vsyncpa [#allocation3], 1 }
 0x2c1   :  { %332 = vsyncpa [#allocation6], 1 }
 0x2c2   :  { %333 = vsyncpa [#allocation4], 1 }

</bundles_post_ra>
